<compile_context>
chip_gen: v5e
topology: v5e:2x2
jax: 0.10.0
libtpu: 0.0.40
codegen_flags: <defaults>
</compile_context>

<pallas_src>
import math

import jax
import jax.numpy as jnp
from jax.experimental import pallas as pl
from jax.experimental.pallas import tpu as pltpu


_VMEM_LIMIT_BYTES = 32 * 1024 * 1024   # explicit: v7x scoped default; safe on v5e/v6e
_VMEM_BUDGET_BYTES = 24 * 1024 * 1024  # leave headroom for compiler scratch


def _make_dense_kernel(use_bias, activation, residual, dup_residual):
    """Kernel body; all flags are static Python values.

    Ref order: x_ref, w_ref, [b_ref], [d_ref], o_ref
      x_ref : (Bt, C*Fin)      channel-flattened batch tile
      w_ref : (C*Fin, C*Fout)  block-diagonal weight bank (VMEM resident)
      b_ref : (1, C*Fout)      gathered bias row
      d_ref : (C*Fin, C*Fout)  0/1 duplication matrix (Fout == 2*Fin residual)
      o_ref : (Bt, C*Fout)
    """

    def kernel(*refs):
        it = iter(refs)
        x_ref = next(it)
        w_ref = next(it)
        b_ref = next(it) if use_bias else None
        d_ref = next(it) if dup_residual else None
        o_ref = next(it)

        x = x_ref[...]
        # ONE lane-dense MXU matmul (K = C*Fin, N = C*Fout): no per-channel
        # 32-wide slices, no lane concat, no per-channel bias broadcasts.
        out = jnp.dot(x, w_ref[...], preferred_element_type=jnp.float32)
        if use_bias:
            out = out + b_ref[...]            # single lane-dense VPU add
        if activation:
            out = jnp.tanh(out)               # lane-dense EUP
        if residual:
            if dup_residual:
                # residual = x duplicated into both Fin-halves of each channel's
                # Fout = 2*Fin block, formed lane-dense on the (idle) MXU.
                out = out + jnp.dot(x, d_ref[...],
                                    preferred_element_type=jnp.float32)
            else:                             # Fout == Fin: flat layouts align
                out = out + x
        o_ref[...] = out.astype(o_ref.dtype)  # single lane-dense store

    return kernel


def pack_dense_params(weight, channels, bias=None, *, residual=False):
    """One-time gather + block-diagonal construction.

    Hoist this out of the per-call path when `weight`/`channels` are static
    across many forward calls (perf-review item: avoid re-running the gather/
    transpose/pack every invocation).
    """
    NC, Fout, Fin = weight.shape
    C = int(channels.shape[0])
    channels = channels.astype(jnp.int32)

    if residual and Fout not in (Fin, 2 * Fin):
        raise NotImplementedError("Not implemented")

    w_g = jnp.transpose(weight[channels], (0, 2, 1))          # (C, Fin, Fout)
    eye_c = jnp.eye(C, dtype=weight.dtype)

    # W_bd[c*Fin+i, d*Fout+j] = delta(c, d) * w_g[c, i, j]
    # (built via exact 0/1 broadcast-multiply, no dot -> bit-exact weights)
    w_bd = (eye_c[:, None, :, None] * w_g[:, :, None, :]).reshape(C * Fin, C * Fout)

    b_row = None
    if bias is not None:
        b_row = bias[channels].reshape(1, C * Fout)           # lane-dense bias row

    d_bd = None
    if residual and Fout == 2 * Fin:
        dup = jnp.concatenate(
            [jnp.eye(Fin, dtype=weight.dtype)] * 2, axis=1)   # (Fin, 2*Fin)
        d_bd = (eye_c[:, None, :, None] * dup[None, :, None, :]
                ).reshape(C * Fin, C * Fout)

    return w_bd, b_row, d_bd


def _pick_b_tile(B, k_dim, n_dim, have_dup):
    """Batch-tile heuristic: VMEM-budgeted, up to 2048 rows, >=2 tiles on big B."""
    # Double-buffered x tile + out tile, f32, per row.
    row_bytes = 2 * 4 * (k_dim + n_dim)
    # Resident bank (W_bd, optional D, bias), counted double-buffered since we
    # leave default pipeline buffering (at large C*F, single-buffer these
    # constant-index specs with pipeline_mode=pl.Buffered(1)).
    resident = 2 * 4 * (k_dim * n_dim * (2 if have_dup else 1) + n_dim)
    avail = _VMEM_BUDGET_BYTES - resident
    fit = max(8, (avail // row_bytes) // 8 * 8) if avail > row_bytes * 8 else 8
    bt = min(2048, fit)                 # mem-bound: big tiles amortize step cost
    if B > 16:
        # v7x megacore: guarantee >= 2 batch tiles so the "parallel" grid axis
        # can be split across its 2 TensorCores (neutral on v5e/v6e).
        half = ((B + 1) // 2 + 7) // 8 * 8
        bt = min(bt, half)
    if bt >= B:
        bt = B                          # single full-batch tile
    return bt


def dense_forward(x, channels, weight, bias=None, *, activation=False,
                  residual=False, b_tile=None, packed=None):
    """Pallas equivalent of Dense.forward((x, channels)). Returns (out, channels)."""
    B, C, Fin = x.shape
    NC, Fout, Fin_w = weight.shape
    assert Fin_w == Fin
    assert channels.shape == (C,)
    if residual and Fout not in (Fin, 2 * Fin):
        raise NotImplementedError("Not implemented")

    channels = channels.astype(jnp.int32)
    if packed is None:
        packed = pack_dense_params(weight, channels, bias, residual=residual)
    w_bd, b_row, d_bd = packed
    use_bias = b_row is not None
    dup_residual = d_bd is not None

    k_dim = C * Fin
    n_dim = C * Fout

    # Free contiguous reshape (no HBM transpose): channel-flattened activations.
    x2 = x.reshape(B, k_dim)

    if b_tile is None:
        b_tile = _pick_b_tile(B, k_dim, n_dim, dup_residual)
    grid = (pl.cdiv(B, b_tile),)

    in_specs = [
        # x: one batch tile per grid step, lane-dense last dim (C*Fin)
        pl.BlockSpec((b_tile, k_dim), lambda i: (i, 0)),
        # block-diagonal weight bank: constant block index -> VMEM resident
        pl.BlockSpec((k_dim, n_dim), lambda i: (0, 0)),
    ]
    operands = [x2, w_bd]
    if use_bias:
        in_specs.append(pl.BlockSpec((1, n_dim), lambda i: (0, 0)))
        operands.append(b_row)
    if dup_residual:
        in_specs.append(pl.BlockSpec((k_dim, n_dim), lambda i: (0, 0)))
        operands.append(d_bd)

    kernel = _make_dense_kernel(use_bias, activation, residual, dup_residual)

    # NOTE: on v6e/v7x, carrying x2/out2 as bf16 at the HBM boundary (f32 math
    # inside) would ~halve HBM traffic; kept f32 to preserve module semantics.
    out2 = pl.pallas_call(
        kernel,
        out_shape=jax.ShapeDtypeStruct((B, n_dim), x.dtype),
        grid_spec=pltpu.PrefetchScalarGridSpec(
            num_scalar_prefetch=0,
            grid=grid,
            in_specs=in_specs,
            out_specs=pl.BlockSpec((b_tile, n_dim), lambda i: (i, 0)),
        ),
        compiler_params=pltpu.CompilerParams(
            # batch tiles are independent -> shard across v7x's 2 TensorCores
            dimension_semantics=("parallel",),
            vmem_limit_bytes=_VMEM_LIMIT_BYTES,
        ),
    )(*operands)

    # Free contiguous reshape back to (B, C, Fout).
    return out2.reshape(B, C, Fout), channels


def init_dense_params(key, num_channels, in_features, out_features,
                      use_bias=True):
    """Deterministic init mirroring Dense.reset_parameters distributions."""
    kw, kb = jax.random.split(key)
    bound = 1.0 / math.sqrt(in_features)
    weight = jax.random.uniform(
        kw, (num_channels, out_features, in_features),
        minval=-bound, maxval=bound, dtype=jnp.float32)
    bias = None
    if use_bias:
        bias = jax.random.uniform(
            kb, (num_channels, out_features),
            minval=-bound, maxval=bound, dtype=jnp.float32)
    return weight, bias


def dense_reference(x, channels, weight, bias=None, *, activation=False,
                    residual=False):
    """Plain-JAX reference matching the PyTorch forward."""
    w = weight[channels]                                     # (C, Fout, Fin)
    out = jnp.einsum("bci,coi->bco", x, w, precision="highest")
    if bias is not None:
        out = out + bias[channels]
    if activation:
        out = jnp.tanh(out)
    if residual:
        if out.shape[2] == x.shape[2]:
            out = out + x
        elif out.shape[2] == 2 * x.shape[2]:
            out = out + jnp.concatenate([x, x], axis=2)
        else:
            raise NotImplementedError("Not implemented")
    return out, channels


if __name__ == "__main__":
    key = jax.random.PRNGKey(0)

    num_channels = 4       # size of the parameter bank
    Fin = 32
    channels = jnp.array([3, 1, 0, 2], dtype=jnp.int32)      # C = 4
    C = int(channels.shape[0])

    # cover: (Fout==Fin, residual), (Fout==2*Fin, residual via dup-matmul),
    #        (no bias / no act), and a multi-tile ragged-batch case.
    configs = [
        dict(B=8,  Fout=32, use_bias=True,  activation=True,  residual=True),
        dict(B=8,  Fout=64, use_bias=True,  activation=True,  residual=True),
        dict(B=8,  Fout=48, use_bias=False, activation=False, residual=False),
        dict(B=40, Fout=32, use_bias=True,  activation=True,  residual=True),
    ]

    for i, cfg in enumerate(configs):
        k_x, k_p = jax.random.split(jax.random.fold_in(key, i))
        x = jax.random.normal(k_x, (cfg["B"], C, Fin), dtype=jnp.float32)
        weight, bias = init_dense_params(k_p, num_channels, Fin, cfg["Fout"],
                                         use_bias=cfg["use_bias"])

        out, _ = dense_forward(x, channels, weight, bias,
                               activation=cfg["activation"],
                               residual=cfg["residual"])
        out = jax.block_until_ready(out)

        ref, _ = dense_reference(x, channels, weight, bias,
                                 activation=cfg["activation"],
                                 residual=cfg["residual"])
        assert out.shape == (cfg["B"], C, cfg["Fout"])
        assert jnp.allclose(out, ref, atol=1e-4, rtol=1e-4), \
            f"mismatch vs reference for config {cfg}"

    print("KERNEL_OK")
</pallas_src>

<mosaic_0001>
module attributes {stable_mosaic.version = 11 : i64} {
  func.func @kernel(%arg0: i32, %arg1: memref<8x128xf32, #tpu.memory_space<vmem>>, %arg2: memref<128x128xf32, #tpu.memory_space<vmem>>, %arg3: memref<1x128xf32, #tpu.memory_space<vmem>>, %arg4: memref<8x128xf32, #tpu.memory_space<vmem>>) attributes {dimension_semantics = [#tpu.dimension_semantics<parallel>], iteration_bounds = array<i64: 1>, scalar_prefetch = 0 : i64, scratch_operands = 0 : i64, tpu.core_type = #tpu.core_type<tc>, window_params = [{transform_indices = @transform_0, window_bounds = array<i64: 8, 128>}, {pipeline_mode = #tpu.pipeline_mode<synchronous>, transform_indices = @transform_1, window_bounds = array<i64: 128, 128>}, {pipeline_mode = #tpu.pipeline_mode<synchronous>, transform_indices = @transform_2, window_bounds = array<i64: 1, 128>}, {transform_indices = @transform_3, window_bounds = array<i64: 8, 128>}]} {
    %c0 = arith.constant 0 : index
    %c0_0 = arith.constant 0 : index
    %0 = vector.load %arg1[%c0, %c0_0] : memref<8x128xf32, #tpu.memory_space<vmem>>, vector<8x128xf32>
    %c0_1 = arith.constant 0 : index
    %c0_2 = arith.constant 0 : index
    %1 = vector.load %arg2[%c0_1, %c0_2] : memref<128x128xf32, #tpu.memory_space<vmem>>, vector<128x128xf32>
    %cst = arith.constant dense<0.000000e+00> : vector<8x128xf32>
    %2 = tpu.matmul %0, %1, %cst {dimension_numbers = #tpu.dot_dimension_numbers<[1], [0], [0], [1], [0, 0, 1, 1], [], []>} : vector<8x128xf32>, vector<128x128xf32>, vector<8x128xf32> -> vector<8x128xf32>
    %c0_3 = arith.constant 0 : index
    %c0_4 = arith.constant 0 : index
    %3 = vector.load %arg3[%c0_3, %c0_4] : memref<1x128xf32, #tpu.memory_space<vmem>>, vector<1x128xf32>
    %4 = vector.broadcast %3 : vector<1x128xf32> to vector<8x128xf32>
    %5 = arith.addf %2, %4 : vector<8x128xf32>
    %6 = math.tanh %5 : vector<8x128xf32>
    %7 = arith.addf %6, %0 : vector<8x128xf32>
    %c0_5 = arith.constant 0 : index
    %c0_6 = arith.constant 0 : index
    %8 = vector.load %arg4[%c0_5, %c0_6] : memref<8x128xf32, #tpu.memory_space<vmem>>, vector<8x128xf32>
    tpu.vector_store %arg4[%c0_5, %c0_6], %7 {strides = array<i32>} : memref<8x128xf32, #tpu.memory_space<vmem>>, vector<8x128xf32>,
    return
  }
  func.func @transform_0(%arg0: i32) -> (i32, i32) {
    %c0_i32 = arith.constant 0 : i32
    %c0_i32_0 = arith.constant 0 : i32
    return %arg0, %c0_i32 : i32, i32
  }
  func.func @transform_1(%arg0: i32) -> (i32, i32) {
    %c0_i32 = arith.constant 0 : i32
    %c0_i32_0 = arith.constant 0 : i32
    %c0_i32_1 = arith.constant 0 : i32
    return %c0_i32, %c0_i32_0 : i32, i32
  }
  func.func @transform_2(%arg0: i32) -> (i32, i32) {
    %c0_i32 = arith.constant 0 : i32
    %c0_i32_0 = arith.constant 0 : i32
    %c0_i32_1 = arith.constant 0 : i32
    return %c0_i32, %c0_i32_0 : i32, i32
  }
  func.func @transform_3(%arg0: i32) -> (i32, i32) {
    %c0_i32 = arith.constant 0 : i32
    %c0_i32_0 = arith.constant 0 : i32
    return %arg0, %c0_i32 : i32, i32
  }
}

</mosaic_0001>

<bundles_post_ra>
// kernel: tpu_custom_call.1
= control target key start
LH: loop header
LB: loop body
LE: loop exit
PB: predicated region body
PF: predicated region fallthrough
CT: control target
= control target key end

     0   :  { %8 = vsyncpa [#allocation3], 0  ;;  %s230_s0 = inlined_call_operand.hbm [shape: f32[8,128], index: 0, kind: input, shape index: {}]   ;;  %s231_s1 = inlined_call_operand.hbm [shape: f32[128,128], index: 1, kind: input, shape index: {}]   ;;  %s232_s2 = inlined_call_operand.vmem [shape: f32[1,128], index: 2, kind: input, shape index: {}]   ;;  %s233_s3 = inlined_call_operand.hbm [shape: f32[8,128], index: 3, kind: output, shape index: {}]  }
   0x1   :  { %9 = vsyncpa [#allocation6], 0 }
   0x2   :  { %10 = vsyncpa [#allocation4], 0  ;;  %s16_s14 = sshll.u32 %s230_s0, 4  ;;  %s193_s15 = smov [#allocation2]   ;;  %s17_s14 = int_to_ptr.hbm [resolvable:$true] %s16_s14 }
   0x3   :  { %s18_s16 = sshll.u32 %s193_s15, 4  ;;  %s26_s19 = sshll.u32 %s231_s1, 4  ;;  %s19_s16 = int_to_ptr.vmem [resolvable:$true] %s18_s16  ;;  %s27_s19 = int_to_ptr.hbm [resolvable:$true] %s26_s19 }
   0x4   :  { %21 = dma.hbm_to_vmem [thread:$0]  %s17_s14, 128, %s19_s16, [#allocation3]  }
   0x5   :  { %s194_s20 = smov [#allocation5]   ;;  %s195_s22 = smov 128  }
   0x6   :  { %s28_s21 = sshll.u32 %s194_s20, 4  ;;  %s196_s23 = smov 8   ;;  %s29_s21 = int_to_ptr.vmem [resolvable:$true] %s28_s21 }
   0x7   :  { %34 = dma.hbm_to_vmem [thread:$0]  %s27_s19, 2048, %s29_s21, [#allocation6], %s195_s22, %s195_s22, %s196_s23  }
   0x8   :  { %187 = dma.done.wait [#allocation3], 128  }
   0x9   :  { %188 = vsyncadd [#allocation3], 4294967168 }
   0xa   :  { %189 = dma.done.wait [#allocation6], 2048  }
   0xb   :  { %190 = vsyncadd [#allocation6], 4294965248  ;;  %v61_v0 = vld [vmem:[#allocation5 + $0x78] sm:$0xff]  ;;  %v60_v1 = vld [vmem:[#allocation5 + $0x70] sm:$0xff]  ;;  %s197_s24 = smov [#allocation7]   ;;  %s96_s28 = sshll.u32 %s233_s3, 4  ;;  %s97_s28 = int_to_ptr.hbm [resolvable:$true] %s96_s28 }
   0xc   :  { %66 = vmatpush.msra.mxu0 %v61_v0  ;;  %v59_v2 = vld [vmem:[#allocation5 + $0x68] sm:$0xff]  ;;  %v58_v3 = vld [vmem:[#allocation5 + $0x60] sm:$0xff]  ;;  %v57_v4 = vld [vmem:[#allocation5 + $0x58] sm:$0xff]  ;;  %s94_s25 = sshll.u32 %s197_s24, 4  ;;  %s95_s25 = int_to_ptr.vmem [resolvable:$true] %s94_s25 }
   0xd   :  { %v56_v5 = vld [vmem:[#allocation5 + $0x50] sm:$0xff]  ;;  %v55_v6 = vld [vmem:[#allocation5 + $0x48] sm:$0xff]  ;;  %v54_v7 = vld [vmem:[#allocation5 + $0x40] sm:$0xff] }
   0xe   :  { %67 = vmatpush.msra.mxu0 %v60_v1  ;;  %v53_v8 = vld [vmem:[#allocation5 + $0x38] sm:$0xff]  ;;  %v52_v9 = vld [vmem:[#allocation5 + $0x30] sm:$0xff]  ;;  %v51_v10 = vld [vmem:[#allocation5 + $0x28] sm:$0xff] }
   0xf   :  { %v50_v11 = vld [vmem:[#allocation5 + $0x20] sm:$0xff]  ;;  %v49_v12 = vld [vmem:[#allocation5 + $0x18] sm:$0xff]  ;;  %v48_v13 = vld [vmem:[#allocation5 + $0x10] sm:$0xff] }
  0x10   :  { %68 = vmatpush.msra.mxu0 %v59_v2  ;;  %v47_v14 = vld [vmem:[#allocation5 + $0x8] sm:$0xff]  ;;  %v46_v15 = vld [vmem:[#allocation5] sm:$0xff]  ;;  %v45_v16 = vld [vmem:[#allocation2] sm:$0xff] }
  0x11   :  { %v112_v17 = vld [vmem:[%s232_s2] ss:$0 sm:$0xff] }
  0x12   :  { %69 = vmatpush.msra.mxu0 %v58_v3 }
  0x14   :  { %70 = vmatpush.msra.mxu0 %v57_v4 }
  0x16   :  { %71 = vmatpush.msra.mxu0 %v56_v5 }
  0x18   :  { %72 = vmatpush.msra.mxu0 %v55_v6 }
  0x1a   :  { %73 = vmatpush.msra.mxu0 %v54_v7 }
  0x1c   :  { %74 = vmatpush.msra.mxu0 %v53_v8 }
  0x1e   :  { %75 = vmatpush.msra.mxu0 %v52_v9 }
  0x20   :  { %76 = vmatpush.msra.mxu0 %v51_v10 }
  0x22   :  { %77 = vmatpush.msra.mxu0 %v50_v11 }
  0x24   :  { %78 = vmatpush.msra.mxu0 %v49_v12 }
  0x26   :  { %79 = vmatpush.msra.mxu0 %v48_v13 }
  0x28   :  { %80 = vmatpush.msra.mxu0 %v47_v14 }
  0x2a   :  { %81 = vmatpush.msra.mxu0 %v46_v15 }
  0x2b   :  { %82 = vmatmul.f32.vlgmr.msra.gmra.mxu0 %v45_v16 }
  0xa8   :  { %v83_v18 = vpop.f32.mrf.mxu0 }
  0xa9   :  { %v84_v19 = vadd.f32 %v112_v17, %v83_v18 }
  0xab   :  { %113 = vtanh.f32 %v84_v19 }
  0xb1   :  { %v114_v20 = vpop.eup %113 }
  0xb2   :  { %v87_v21 = vadd.f32 %v114_v20, %v45_v16 }
  0xb4   :  { %88 = vst [vmem:[#allocation7] sm:$0xff] %v87_v21 }
  0xb5   :  { %99 = dma.vmem_to_hbm [thread:$0]  %s95_s25, 128, %s97_s28, [#allocation4]  }
  0xb6   :  { %191 = dma.done.wait [#allocation4], 128  }
  0xb7   :  { %192 = vsyncadd [#allocation4], 4294967168 }
  0xb8   :  { %104 = vsyncpa [#allocation3], 1 }
  0xb9   :  { %105 = vsyncpa [#allocation6], 1 }
  0xba   :  { %106 = vsyncpa [#allocation4], 1 }

</bundles_post_ra>
